<compile_context>
chip_gen: v5e
topology: v5e:2x2
jax: 0.10.0
libtpu: 0.0.40
codegen_flags: <defaults>
</compile_context>

<pallas_src>
import functools

import jax
import jax.numpy as jnp
from jax import lax
from jax.experimental import pallas as pl
from jax.experimental.pallas import tpu as pltpu

_MAX_CORES = 2      # v7x has 2 TensorCores per chip; harmless (size-1 axis) elsewhere
_TM_CAP = 2048      # tile-size sweeps saturate the HBM roofline well before this


def _vmem_capacity_bytes():
    """Physical VMEM per TensorCore (generation aware), with a safe fallback."""
    try:
        cap = int(pltpu.get_tpu_info().vmem_capacity_bytes)
        if cap > 0:
            return cap
    except Exception:
        pass
    return 64 * 1024 * 1024     # v7x-sized fallback: conservative everywhere


def _pick_batch_tile(B, d_in, d_out, itemsize, budget_bytes):
    """Largest power-of-two batch tile (dtype-aware sublane multiple) whose
    steady-state VMEM footprint fits `budget_bytes`, capped so both cores get
    work and per-step latency stays bounded."""
    min_tile = {4: 8, 2: 16, 1: 32}.get(itemsize, 8)

    def footprint(tm):
        return (2 * tm * d_in * itemsize        # x tile        (double-buffered)
                + 2 * tm * d_out * itemsize     # targets tile  (double-buffered)
                + d_in * d_out * itemsize       # weight        (resident, 1 buffer)
                + d_out * itemsize)             # bias          (resident, 1 buffer)

    per_core_rows = -(-B // _MAX_CORES)
    target = max(min_tile, -(-per_core_rows // min_tile) * min_tile)
    tm = min_tile
    while tm * 2 <= target and footprint(tm * 2) <= budget_bytes:
        tm *= 2
    return min(tm, _TM_CAP)


def _regularized_loss_kernel(x_ref, wt_ref, b_ref, t_ref, out_ref, sse_ref, *,
                             lambda_reg, inv_n, batch, tm, tiles_per_core,
                             needs_mask):
    c = pl.program_id(0)        # core axis       ("parallel")
    i = pl.program_id(1)        # batch-tile axis ("arbitrary", per core)

    @pl.when(i == 0)
    def _init():
        sse_ref[0] = jnp.float32(0.0)

    # --- hot loop: plain MXU matmul + VALU, scalar fold into SMEM ---
    # x: [tm, D_IN], wt: [D_IN, D_OUT] (pre-transposed once in the wrapper).
    y = jnp.dot(x_ref[...], wt_ref[...], preferred_element_type=jnp.float32)
    y = y + b_ref[...].astype(jnp.float32)               # broadcast bias
    d = y - t_ref[...].astype(jnp.float32)
    d2 = d * d
    if needs_mask:
        # zero the contribution of padded batch rows (wrapper zero-pads x/t,
        # so these rows exist in VMEM but must not count toward the SSE).
        row0 = (c * tiles_per_core + i) * tm
        rows = row0 + lax.broadcasted_iota(jnp.int32, d2.shape, 0)
        d2 = jnp.where(rows < batch, d2, 0.0)
    # fold to a scalar per step: keeps VMEM free of a [tm, D_OUT] accumulator
    # and relieves the vector-store slot; the XLU reduce slot is idle anyway.
    sse_ref[0] = sse_ref[0] + jnp.sum(d2)

    # --- finalize (once per core): scale, add the L2 regularizer on core 0 ---
    @pl.when(i == tiles_per_core - 1)
    def _finalize():
        mse_part = sse_ref[0] * inv_n
        out_ref[0, 0] = mse_part

        @pl.when(c == 0)
        def _add_reg():
            # W/bias are grid-constant and resident; norms computed once.
            wf = wt_ref[...].astype(jnp.float32)
            bf = b_ref[...].astype(jnp.float32)
            l2 = jnp.sqrt(jnp.sum(wf * wf)) + jnp.sqrt(jnp.sum(bf * bf))
            out_ref[0, 0] = mse_part + lambda_reg * l2


def regularized_loss(inputs, weight, bias, targets, lambda_reg, tile_rows=None):
    """inputs: [B, D_IN], weight: [D_OUT, D_IN] (PyTorch layout), bias: [D_OUT],
    targets: [B, D_OUT] -> scalar f32 loss."""
    B, D_IN = inputs.shape
    D_OUT = weight.shape[0]
    itemsize = inputs.dtype.itemsize

    cap = _vmem_capacity_bytes()
    budget = int(cap * 0.6)
    tm = int(tile_rows) if tile_rows else _pick_batch_tile(B, D_IN, D_OUT,
                                                           itemsize, budget)

    num_tiles = pl.cdiv(B, tm)
    n_cores = min(_MAX_CORES, num_tiles)
    tiles_per_core = pl.cdiv(num_tiles, n_cores)
    rows_covered = n_cores * tiles_per_core * tm
    needs_mask = rows_covered != B

    # Pad streamed operands (only when needed) so every block is in-bounds;
    # the in-kernel row mask keeps padded rows out of the SSE.
    if needs_mask:
        pad = rows_covered - B
        inputs_p = jnp.pad(inputs, ((0, pad), (0, 0)))
        targets_p = jnp.pad(targets, ((0, pad), (0, 0)))
    else:
        inputs_p, targets_p = inputs, targets

    # One-time layout fix: [D_OUT, D_IN] -> [D_IN, D_OUT] so the kernel's dot
    # needs no per-step transpose.  ||W||_F is transpose-invariant.
    w_t = jnp.transpose(weight)

    kernel = functools.partial(
        _regularized_loss_kernel,
        # lambda_reg is a constructor constant in the PyTorch module, so baking
        # it at trace time matches the spec (pass via SMEM if it must vary).
        lambda_reg=float(lambda_reg),
        inv_n=1.0 / float(B * D_OUT),
        batch=B, tm=tm, tiles_per_core=tiles_per_core, needs_mask=needs_mask)

    bytes_accessed = (inputs.size * inputs.dtype.itemsize
                      + weight.size * weight.dtype.itemsize
                      + bias.size * bias.dtype.itemsize
                      + targets.size * targets.dtype.itemsize
                      + 4 * n_cores)
    cost = pl.CostEstimate(
        flops=(2 * B * D_IN * D_OUT + 3 * B * D_OUT
               + 2 * (weight.size + bias.size)),
        transcendentals=2,
        bytes_accessed=bytes_accessed,
    )

    resident = dict(pipeline_mode=pl.Buffered(1))   # grid-constant operands

    partials = pl.pallas_call(
        kernel,
        out_shape=jax.ShapeDtypeStruct((n_cores, 1), jnp.float32),
        grid=(n_cores, tiles_per_core),
        in_specs=[
            pl.BlockSpec((tm, D_IN), lambda c, i: (c * tiles_per_core + i, 0)),
            pl.BlockSpec((D_IN, D_OUT), lambda c, i: (0, 0), **resident),
            pl.BlockSpec((1, D_OUT), lambda c, i: (0, 0), **resident),
            pl.BlockSpec((tm, D_OUT), lambda c, i: (c * tiles_per_core + i, 0)),
        ],
        out_specs=pl.BlockSpec((1, 1), lambda c, i: (c, 0),
                               memory_space=pltpu.SMEM),   # per-core scalar partial
        scratch_shapes=[pltpu.SMEM((1,), jnp.float32)],    # per-core SSE accumulator
        compiler_params=pltpu.CompilerParams(
            dimension_semantics=("parallel", "arbitrary"),
            vmem_limit_bytes=int(cap * 0.85),
        ),
        cost_estimate=cost,
    )(inputs_p, w_t, bias.reshape(1, D_OUT), targets_p)

    # Core 0's partial already carries lambda * L2; summing the per-core MSE
    # partials yields the full loss.
    return jnp.sum(partials)


def _reference(inputs, weight, bias, targets, lambda_reg):
    y = inputs @ weight.T + bias
    mse = jnp.mean((y - targets) ** 2)
    l2 = jnp.sqrt(jnp.sum(weight ** 2)) + jnp.sqrt(jnp.sum(bias ** 2))
    return mse + lambda_reg * l2


if __name__ == "__main__":
    lambda_reg = 0.01
    key = jax.random.PRNGKey(0)

    def make(B, D_IN, D_OUT):
        k_x, k_w, k_b, k_t = jax.random.split(jax.random.fold_in(key, B), 4)
        inputs = jax.random.normal(k_x, (B, D_IN), dtype=jnp.float32)
        weight = jax.random.normal(k_w, (D_OUT, D_IN), dtype=jnp.float32) * 0.1
        bias = jax.random.normal(k_b, (D_OUT,), dtype=jnp.float32) * 0.1
        targets = jax.random.normal(k_t, (B, D_OUT), dtype=jnp.float32)
        return inputs, weight, bias, targets

    # 1) canonical small case (single tile, single core path)
    x, w, b, t = make(8, 32, 16)
    loss = jax.block_until_ready(regularized_loss(x, w, b, t, lambda_reg))
    ref = _reference(x, w, b, t, lambda_reg)
    assert jnp.allclose(loss, ref, rtol=1e-5, atol=1e-5), (loss, ref)

    # 2) multi-tile + dual-core split (forced small tile to exercise both axes)
    x, w, b, t = make(32, 32, 16)
    loss = jax.block_until_ready(regularized_loss(x, w, b, t, lambda_reg, tile_rows=8))
    ref = _reference(x, w, b, t, lambda_reg)
    assert jnp.allclose(loss, ref, rtol=1e-5, atol=1e-5), (loss, ref)

    # 3) awkward batch size (padding + in-kernel row mask)
    x, w, b, t = make(20, 32, 16)
    loss = jax.block_until_ready(regularized_loss(x, w, b, t, lambda_reg, tile_rows=8))
    ref = _reference(x, w, b, t, lambda_reg)
    assert jnp.allclose(loss, ref, rtol=1e-5, atol=1e-5), (loss, ref)

    print("KERNEL_OK")
</pallas_src>

<mosaic_0001>
module attributes {stable_mosaic.version = 11 : i64} {
  func.func @_regularized_loss_kernel(%arg0: i32, %arg1: i32, %arg2: memref<8x32xf32, #tpu.memory_space<vmem>>, %arg3: memref<32x16xf32, #tpu.memory_space<vmem>>, %arg4: memref<1x16xf32, #tpu.memory_space<vmem>>, %arg5: memref<8x16xf32, #tpu.memory_space<vmem>>, %arg6: memref<1x1xf32, #tpu.memory_space<smem>>, %arg7: memref<1xf32, #tpu.memory_space<smem>>) attributes {dimension_semantics = [#tpu.dimension_semantics<parallel>, #tpu.dimension_semantics<arbitrary>], iteration_bounds = array<i64: 1, 1>, scalar_prefetch = 0 : i64, scratch_operands = 1 : i64, tpu.core_type = #tpu.core_type<tc>, window_params = [{transform_indices = @transform_0, window_bounds = array<i64: 8, 32>}, {pipeline_mode = #tpu.pipeline_mode<synchronous>, transform_indices = @transform_1, window_bounds = array<i64: 32, 16>}, {pipeline_mode = #tpu.pipeline_mode<synchronous>, transform_indices = @transform_2, window_bounds = array<i64: 1, 16>}, {transform_indices = @transform_3, window_bounds = array<i64: 8, 16>}, {transform_indices = @transform_4, window_bounds = array<i64: 1, 1>}]} {
    %c0_i32 = arith.constant 0 : i32
    %0 = arith.cmpi eq, %arg1, %c0_i32 : i32
    %1 = arith.extui %0 : i1 to i32
    %c0_i32_0 = arith.constant 0 : i32
    %2 = arith.cmpi ne, %1, %c0_i32_0 : i32
    scf.if %2 {
      %cst_13 = arith.constant 0.000000e+00 : f32
      %c0_14 = arith.constant 0 : index
      %22 = memref.load %arg7[%c0_14] : memref<1xf32, #tpu.memory_space<smem>>
      memref.store %cst_13, %arg7[%c0_14] : memref<1xf32, #tpu.memory_space<smem>>
    } else {
    }
    %c0 = arith.constant 0 : index
    %c0_1 = arith.constant 0 : index
    %3 = vector.load %arg2[%c0, %c0_1] : memref<8x32xf32, #tpu.memory_space<vmem>>, vector<8x32xf32>
    %c0_2 = arith.constant 0 : index
    %c0_3 = arith.constant 0 : index
    %4 = vector.load %arg3[%c0_2, %c0_3] : memref<32x16xf32, #tpu.memory_space<vmem>>, vector<32x16xf32>
    %cst = arith.constant dense<0.000000e+00> : vector<8x16xf32>
    %5 = tpu.matmul %3, %4, %cst {dimension_numbers = #tpu.dot_dimension_numbers<[1], [0], [0], [1], [0, 0, 1, 1], [], []>} : vector<8x32xf32>, vector<32x16xf32>, vector<8x16xf32> -> vector<8x16xf32>
    %c0_4 = arith.constant 0 : index
    %c0_5 = arith.constant 0 : index
    %6 = vector.load %arg4[%c0_4, %c0_5] : memref<1x16xf32, #tpu.memory_space<vmem>>, vector<1x16xf32>
    %7 = vector.broadcast %6 : vector<1x16xf32> to vector<8x16xf32>
    %8 = arith.addf %5, %7 : vector<8x16xf32>
    %c0_6 = arith.constant 0 : index
    %c0_7 = arith.constant 0 : index
    %9 = vector.load %arg5[%c0_6, %c0_7] : memref<8x16xf32, #tpu.memory_space<vmem>>, vector<8x16xf32>
    %10 = arith.subf %8, %9 : vector<8x16xf32>
    %11 = arith.mulf %10, %10 : vector<8x16xf32>
    %c0_8 = arith.constant 0 : index
    %12 = memref.load %arg7[%c0_8] : memref<1xf32, #tpu.memory_space<smem>>
    %13 = vector.shape_cast %11 : vector<8x16xf32> to vector<1x8x16xf32>
    %cst_9 = arith.constant dense<0.000000e+00> : vector<1xf32>
    %14 = vector.multi_reduction <add>, %13, %cst_9 [1, 2] : vector<1x8x16xf32> to vector<1xf32>
    %15 = vector.shape_cast %14 : vector<1xf32> to vector<1x1x1xf32>
    %16 = vector.extract %15[0, 0, 0] : f32 from vector<1x1x1xf32>
    %17 = arith.addf %12, %16 : f32
    %c0_10 = arith.constant 0 : index
    %18 = memref.load %arg7[%c0_10] : memref<1xf32, #tpu.memory_space<smem>>
    memref.store %17, %arg7[%c0_10] : memref<1xf32, #tpu.memory_space<smem>>
    %c0_i32_11 = arith.constant 0 : i32
    %19 = arith.cmpi eq, %arg1, %c0_i32_11 : i32
    %20 = arith.extui %19 : i1 to i32
    %c0_i32_12 = arith.constant 0 : i32
    %21 = arith.cmpi ne, %20, %c0_i32_12 : i32
    scf.if %21 {
      %c0_13 = arith.constant 0 : index
      %22 = memref.load %arg7[%c0_13] : memref<1xf32, #tpu.memory_space<smem>>
      %cst_14 = arith.constant 7.812500e-03 : f32
      %23 = arith.mulf %22, %cst_14 : f32
      %c0_15 = arith.constant 0 : index
      %c0_16 = arith.constant 0 : index
      %24 = memref.load %arg6[%c0_15, %c0_16] : memref<1x1xf32, #tpu.memory_space<smem>>
      memref.store %23, %arg6[%c0_15, %c0_16] : memref<1x1xf32, #tpu.memory_space<smem>>
      %c0_i32_17 = arith.constant 0 : i32
      %25 = arith.cmpi eq, %arg0, %c0_i32_17 : i32
      %26 = arith.extui %25 : i1 to i32
      %c0_i32_18 = arith.constant 0 : i32
      %27 = arith.cmpi ne, %26, %c0_i32_18 : i32
      scf.if %27 {
        %c0_19 = arith.constant 0 : index
        %c0_20 = arith.constant 0 : index
        %28 = vector.load %arg3[%c0_19, %c0_20] : memref<32x16xf32, #tpu.memory_space<vmem>>, vector<32x16xf32>
        %c0_21 = arith.constant 0 : index
        %c0_22 = arith.constant 0 : index
        %29 = vector.load %arg4[%c0_21, %c0_22] : memref<1x16xf32, #tpu.memory_space<vmem>>, vector<1x16xf32>
        %30 = arith.mulf %28, %28 : vector<32x16xf32>
        %31 = vector.shape_cast %30 : vector<32x16xf32> to vector<1x32x16xf32>
        %cst_23 = arith.constant dense<0.000000e+00> : vector<1xf32>
        %32 = vector.multi_reduction <add>, %31, %cst_23 [1, 2] : vector<1x32x16xf32> to vector<1xf32>
        %33 = vector.shape_cast %32 : vector<1xf32> to vector<1x1x1xf32>
        %34 = vector.extract %33[0, 0, 0] : f32 from vector<1x1x1xf32>
        %35 = math.sqrt %34 : f32
        %36 = arith.mulf %29, %29 : vector<1x16xf32>
        %37 = vector.shape_cast %36 : vector<1x16xf32> to vector<1x1x16xf32>
        %cst_24 = arith.constant dense<0.000000e+00> : vector<1xf32>
        %38 = vector.multi_reduction <add>, %37, %cst_24 [1, 2] : vector<1x1x16xf32> to vector<1xf32>
        %39 = vector.shape_cast %38 : vector<1xf32> to vector<1x1x1xf32>
        %40 = vector.extract %39[0, 0, 0] : f32 from vector<1x1x1xf32>
        %41 = math.sqrt %40 : f32
        %42 = arith.addf %35, %41 : f32
        %cst_25 = arith.constant 0.00999999977 : f32
        %43 = arith.mulf %cst_25, %42 : f32
        %44 = arith.addf %23, %43 : f32
        %c0_26 = arith.constant 0 : index
        %c0_27 = arith.constant 0 : index
        %45 = memref.load %arg6[%c0_26, %c0_27] : memref<1x1xf32, #tpu.memory_space<smem>>
        memref.store %44, %arg6[%c0_26, %c0_27] : memref<1x1xf32, #tpu.memory_space<smem>>
      } else {
      }
    } else {
    }
    return
  }
  func.func @transform_0(%arg0: i32, %arg1: i32) -> (i32, i32) {
    %c1_i32 = arith.constant 1 : i32
    %0 = arith.muli %arg0, %c1_i32 : i32
    %1 = arith.addi %0, %arg1 : i32
    %c0_i32 = arith.constant 0 : i32
    %c0_i32_0 = arith.constant 0 : i32
    return %1, %c0_i32 : i32, i32
  }
  func.func @transform_1(%arg0: i32, %arg1: i32) -> (i32, i32) {
    %c0_i32 = arith.constant 0 : i32
    %c0_i32_0 = arith.constant 0 : i32
    %c0_i32_1 = arith.constant 0 : i32
    return %c0_i32, %c0_i32_0 : i32, i32
  }
  func.func @transform_2(%arg0: i32, %arg1: i32) -> (i32, i32) {
    %c0_i32 = arith.constant 0 : i32
    %c0_i32_0 = arith.constant 0 : i32
    %c0_i32_1 = arith.constant 0 : i32
    return %c0_i32, %c0_i32_0 : i32, i32
  }
  func.func @transform_3(%arg0: i32, %arg1: i32) -> (i32, i32) {
    %c1_i32 = arith.constant 1 : i32
    %0 = arith.muli %arg0, %c1_i32 : i32
    %1 = arith.addi %0, %arg1 : i32
    %c0_i32 = arith.constant 0 : i32
    %c0_i32_0 = arith.constant 0 : i32
    return %1, %c0_i32 : i32, i32
  }
  func.func @transform_4(%arg0: i32, %arg1: i32) -> (i32, i32) {
    %c0_i32 = arith.constant 0 : i32
    %c0_i32_0 = arith.constant 0 : i32
    return %arg0, %c0_i32 : i32, i32
  }
}

</mosaic_0001>

<bundles_post_ra>
// kernel: tpu_custom_call.1
= control target key start
LH: loop header
LB: loop body
LE: loop exit
PB: predicated region body
PF: predicated region fallthrough
CT: control target
= control target key end

     0   :  { %s303_s0 = inlined_call_operand.vmem [shape: f32[8,32], index: 0, kind: input, shape index: {}]   ;;  %s304_s1 = inlined_call_operand.vmem [shape: f32[32,16], index: 1, kind: input, shape index: {}]   ;;  %s305_s2 = inlined_call_operand.vmem [shape: f32[1,16], index: 2, kind: input, shape index: {}]   ;;  %s306_s3 = inlined_call_operand.vmem [shape: f32[8,16], index: 3, kind: input, shape index: {}]   ;;  %s307_s4 = inlined_call_operand.hbm [shape: f32[1,1], index: 4, kind: output, shape index: {}]  }
   0x1   :  { %v62_v0 = vld [vmem:[%s304_s1 + $0x18] sm:$0xff]  ;;  %v61_v1 = vld [vmem:[%s304_s1 + $0x10] sm:$0xff]  ;;  %v60_v2 = vld [vmem:[%s304_s1 + $0x8] sm:$0xff] }
   0x2   :  { %83 = vmatpush.msra.mxu0 %v62_v0 }
   0x3   :  { %9 = vsyncpa [#allocation4], 0  ;;  %v59_v3 = vld [vmem:[%s304_s1] sm:$0xff]  ;;  %vm67_vm0 = vcmask 261120   ;;  %vm160_vm1 = vcmask 122880   ;;  %v126_v10 = vmul.f32 %v60_v2, %v60_v2  ;;  %vm95_vm2 = vcmask 130048  }
   0x4   :  { %84 = vmatpush.msra.mxu0 %v61_v1  ;;  %v58_v4 = vld [vmem:[%s303_s0] sm:$0xff]  ;;  %v125_v9 = vmul.f32 %v59_v3, %v59_v3  ;;  %v127_v14 = vmul.f32 %v61_v1, %v61_v1  ;;  %v128_v20 = vmul.f32 %v62_v0, %v62_v0  ;;  %s194_s9 = sshll.u32 %s307_s4, 4  ;;  %s247_s13 = smov [#allocation3]   ;;  %s195_s9 = int_to_ptr.hbm [resolvable:$true] %s194_s9 }
   0x5   :  { %v124_v5 = vld [vmem:[%s305_s2] sm:$0x1]  ;;  %v130_v16 = vsel %vm95_vm2, %v126_v10, 0.0 }
   0x6   :  { %85 = vmatpush.msra.mxu0 %v60_v2  ;;  %v159_v6 = vmul.f32 %v124_v5, %v124_v5  ;;  %v228_v8 = vld [vmem:[%s305_s2] ss:$0 sm:$0xff]  ;;  %v129_v15 = vsel %vm95_vm2, %v125_v9, 0.0  ;;  %v132_v21 = vsel %vm95_vm2, %v127_v14, 0.0  ;;  %v134_v24 = vsel %vm95_vm2, %v128_v20, 0.0 }
   0x7   :  { %v91_v12 = vld [vmem:[%s306_s3] sm:$0xff]  ;;  %v131_v18 = vadd.f32 %v130_v16, %v129_v15 }
   0x8   :  { %86 = vmatpush.msra.mxu0 %v59_v3  ;;  %v161_v7 = vsel %vm160_vm1, %v159_v6, 0.0 }
   0x9   :  { %216 = vmatmul.msk.f32.vlgmr.msra.gmra.mxu0 %vm67_vm0, %v58_v4  ;;  %162 = vadd.xlane.f32.xlu1 %v161_v7  ;;  %v133_v23 = vadd.f32 %v132_v21, %v131_v18 }
   0xb   :  { %v135_v25 = vadd.f32 %v134_v24, %v133_v23 }
  0x7c   :  { %v163_v40 = vpop.xlane.xlu1 %162 }
  0x7d   :  { %v164_v42 = vrot.slane %v163_v40, 4 }
  0x7f   :  { %v165_v43 = vadd.f32 %v164_v42, %v163_v40 }
  0x81   :  { %v166_v46 = vrot.slane %v165_v43, 2 }
  0x83   :  { %v167_v49 = vadd.f32 %v166_v46, %v165_v43 }
  0x85   :  { %v168_v52 = vrot.slane %v167_v49, 1 }
  0x86   :  { %v88_v11 = vpop.f32.mrf.mxu0 }
  0x87   :  { %v89_v13 = vadd.f32 %v228_v8, %v88_v11  ;;  %v169_v57 = vadd.f32 %v168_v52, %v167_v49 }
  0x89   :  { %v92_v17 = vsub.f32 %v89_v13, %v91_v12 }
  0x8b   :  { %v93_v19 = vmul.f32 %v92_v17, %v92_v17 }
  0x8d   :  { %v96_v22 = vsel %vm95_vm2, %v93_v19, 0.0 }
  0x8e   :  { %97 = vadd.xlane.f32.xlu0 %v96_v22 }
  0x96   :  { %136 = vadd.xlane.f32.xlu0 %v135_v25 }
 0x101   :  { %v98_v26 = vpop.xlane.xlu0 %97 }
 0x102   :  { %v99_v27 = vrot.slane %v98_v26, 4 }
 0x104   :  { %v100_v28 = vadd.f32 %v99_v27, %v98_v26 }
 0x106   :  { %v101_v29 = vrot.slane %v100_v28, 2 }
 0x108   :  { %v102_v30 = vadd.f32 %v101_v29, %v100_v28 }
 0x109   :  { %v137_v31 = vpop.xlane.xlu0 %136 }
 0x10a   :  { %v138_v32 = vrot.slane %v137_v31, 4  ;;  %v103_v33 = vrot.slane %v102_v30, 1 }
 0x10c   :  { %v139_v34 = vadd.f32 %v138_v32, %v137_v31  ;;  %v104_v35 = vadd.f32 %v103_v33, %v102_v30 }
 0x10e   :  { %v140_v36 = vrot.slane %v139_v34, 2  ;;  %217 = vpush %v104_v35 }
 0x110   :  { %v141_v37 = vadd.f32 %v140_v36, %v139_v34 }
 0x112   :  { %v142_v38 = vrot.slane %v141_v37, 1 }
 0x114   :  { %v143_v39 = vadd.f32 %v142_v38, %v141_v37 }
 0x116   :  { %219 = vpush %v143_v39 }
 0x13f   :  { %s297_s2 = spop %217 }
 0x140   :  { %s113_s10 = smul.f32 0.0078125, %s297_s2 }
 0x147   :  { %s220_s3 = spop %219 }
 0x148   :  { %v145_v41 = vstv %s220_s3 }
 0x149   :  { %229 = vrsqrt.f32 %v145_v41  ;;  %vm153_vm3 = vcmp.eq.f32.partialorder %v145_v41, inf  ;;  %v156_v54 = vand.u32 2147483648, %v145_v41  ;;  %vm155_vm4 = vcmp.eq.f32.partialorder %v145_v41, 0.0 }
 0x14f   :  { %v230_v44 = vpop.eup %229 }
 0x150   :  { %v147_v45 = vmul.f32 %v230_v44, %v145_v41 }
 0x152   :  { %v148_v47 = vmul.f32 %v230_v44, %v147_v45 }
 0x154   :  { %v149_v48 = vmul.f32 0.5, %v148_v47 }
 0x156   :  { %v150_v50 = vsub.f32 1.5, %v149_v48 }
 0x158   :  { %v151_v51 = vmul.f32 %v230_v44, %v150_v50 }
 0x15a   :  { %v152_v53 = vmul.f32 %v151_v51, %v145_v41 }
 0x15c   :  { %v154_v55 = vsel %vm153_vm3, %v145_v41, %v152_v53 }
 0x15d   :  { %v157_v56 = vsel %vm155_vm4, %v156_v54, %v154_v55 }
 0x15e   :  { %221 = vpush %v157_v56 }
 0x15f   :  { %223 = vpush %v169_v57 }
 0x18f   :  { %s222_s29 = spop %221 }
 0x190   :  { %s224_s30 = spop %223 }
 0x191   :  { %v171_v58 = vstv %s224_s30 }
 0x192   :  { %231 = vrsqrt.f32 %v171_v58  ;;  %vm179_vm5 = vcmp.eq.f32.partialorder %v171_v58, inf  ;;  %v182_v2 = vand.u32 2147483648, %v171_v58  ;;  %vm181_vm6 = vcmp.eq.f32.partialorder %v171_v58, 0.0 }
 0x198   :  { %v232_v59 = vpop.eup %231 }
 0x199   :  { %v173_v60 = vmul.f32 %v232_v59, %v171_v58 }
 0x19b   :  { %v174_v61 = vmul.f32 %v232_v59, %v173_v60 }
 0x19d   :  { %v175_v62 = vmul.f32 0.5, %v174_v61 }
 0x19f   :  { %v176_v63 = vsub.f32 1.5, %v175_v62 }
 0x1a1   :  { %v177_v0 = vmul.f32 %v232_v59, %v176_v63 }
 0x1a3   :  { %v178_v1 = vmul.f32 %v177_v0, %v171_v58 }
 0x1a5   :  { %v180_v3 = vsel %vm179_vm5, %v171_v58, %v178_v1 }
 0x1a6   :  { %v183_v4 = vsel %vm181_vm6, %v182_v2, %v180_v3 }
 0x1a7   :  { %225 = vpush %v183_v4 }
 0x1d8   :  { %s226_s5 = spop %225 }
 0x1d9   :  { %s185_s6 = sadd.f32 %s226_s5, %s222_s29 }
 0x1db   :  { %s186_s11 = smul.f32 0.01, %s185_s6 }
 0x1dd   :  { %s187_s12 = sadd.f32 %s186_s11, %s113_s10 }
 0x1df   :  { %188 = sst [smem:[#allocation3]] %s187_s12 }
 0x1e0   :  { %197 = dma.smem_to_hbm %s247_s13, 16, %s195_s9, [#allocation4]  }
 0x1e1   :  { %245 = dma.done.wait [#allocation4], 16  }
 0x1e2   :  { %246 = vsyncadd [#allocation4], 4294967280 }
 0x1e3   :  { %202 = sfence }
 0x1e4   :  { %203 = vsyncpa [#allocation4], 1 }

</bundles_post_ra>
